<compile_context>
chip_gen: v6e
topology: v6e:2x2x1
jax: 0.10.0
libtpu: 0.0.40
codegen_flags: <defaults>
</compile_context>

<pallas_src>
import jax
import jax.numpy as jnp
from jax.experimental import pallas as pl
from jax.experimental.pallas import tpu as pltpu  # noqa: F401  (TPU backend)


def _realnvp_fused_kernel(x_ref, mask_ref, w1_ref, b1_ref, w2_ref, b2_ref,
                          w3s_ref, b3s_ref, w3t_ref, b3t_ref,
                          z_ref, ldj_ref):
    K = mask_ref.shape[0]
    D = x_ref.shape[1]

    z = x_ref[...]                               # [B, D] f32, carried in registers
    ldj = jnp.zeros_like(z)                      # log-det accumulator (VMEM/regs only)

    # Static Python unroll over the K coupling transforms.  All stacked
    # weights are already resident in VMEM, so there is no HBM traffic and no
    # extra launch overhead between transforms.
    for k in range(K):
        m = mask_ref[k]                          # [1, D]
        one_minus_m = 1.0 - m

        xm = z * m                               # masked conditioner input

        # Layer 1: [B, D] x [D, H] with tiny D -> do it on the VPU as D
        # broadcast multiply-accumulates instead of an almost-empty MXU pass.
        w1 = w1_ref[k]                           # [D, H]
        h1 = b1_ref[k]                           # [1, H] (broadcasts to [B, H])
        for d in range(D):
            h1 = h1 + xm[:, d:d + 1] * w1[d:d + 1, :]
        h1 = jnp.maximum(h1, 0.0)                # ReLU, [B, H]

        # Layer 2: [B, H] x [H, H] on the MXU.
        h2 = jnp.dot(h1, w2_ref[k], preferred_element_type=jnp.float32) + b2_ref[k]
        h2 = jnp.maximum(h2, 0.0)                # ReLU

        # Layer 3, pre-split into s / t halves (no sub-lane slicing of [B,2D]).
        s = jnp.dot(h2, w3s_ref[k], preferred_element_type=jnp.float32) + b3s_ref[k]
        t = jnp.dot(h2, w3t_ref[k], preferred_element_type=jnp.float32) + b3t_ref[k]

        s = jnp.tanh(s) * one_minus_m            # log-scale, zero on masked dims
        t = t * one_minus_m                      # translation, zero on masked dims

        z = xm + one_minus_m * (z * jnp.exp(s) + t)
        ldj = ldj + s

    z_ref[...] = z
    ldj_ref[...] = ldj


def realnvp_pallas(x, masks, w1, b1, w2, b2, w3, b3):
    """Single fused pallas_call over all K coupling transforms."""
    B, D = x.shape
    K = masks.shape[0]
    H = w1.shape[2]

    # Split the conditioner head into its s- and t-halves once, outside the
    # kernel (cheap XLA slice, done a single time under jit).
    w3s, w3t = w3[:, :, :D], w3[:, :, D:]
    b3s, b3t = b3[:, :, :D], b3[:, :, D:]

    full = lambda shape: pl.BlockSpec(shape, lambda: tuple(0 for _ in shape))

    return pl.pallas_call(
        _realnvp_fused_kernel,
        out_shape=(jax.ShapeDtypeStruct((B, D), jnp.float32),   # z
                   jax.ShapeDtypeStruct((B, D), jnp.float32)),  # log_det_jacobian
        grid=(),
        in_specs=[full((B, D)),                     # x
                  full((K, 1, D)),                  # masks
                  full((K, D, H)), full((K, 1, H)),  # W1, b1
                  full((K, H, H)), full((K, 1, H)),  # W2, b2
                  full((K, H, D)), full((K, 1, D)),  # W3 (s half), b3 (s half)
                  full((K, H, D)), full((K, 1, D))], # W3 (t half), b3 (t half)
        out_specs=(full((B, D)), full((B, D))),
    )(x, masks, w1, b1, w2, b2, w3s, b3s, w3t, b3t)


def init_realnvp_params(key, num_transforms=4, data_dim=2, hidden=32):
    """Deterministic parameter init, returned as K-stacked arrays."""
    masks, w1s, b1s, w2s, b2s, w3s, b3s = [], [], [], [], [], [], []
    for i in range(num_transforms):
        key, k1, k2, k3 = jax.random.split(key, 4)
        # alternating checkerboard mask over the data dims
        mask = jnp.zeros((1, data_dim), jnp.float32).at[0, i % data_dim].set(1.0)
        masks.append(mask)
        w1s.append(0.1 * jax.random.normal(k1, (data_dim, hidden), jnp.float32))
        b1s.append(jnp.zeros((1, hidden), jnp.float32))
        w2s.append(0.1 * jax.random.normal(k2, (hidden, hidden), jnp.float32))
        b2s.append(jnp.zeros((1, hidden), jnp.float32))
        w3s.append(0.1 * jax.random.normal(k3, (hidden, 2 * data_dim), jnp.float32))
        b3s.append(jnp.zeros((1, 2 * data_dim), jnp.float32))
    stack = lambda xs: jnp.stack(xs, axis=0)
    return (stack(masks), stack(w1s), stack(b1s), stack(w2s), stack(b2s),
            stack(w3s), stack(b3s))


@jax.jit
def realnvp_forward(x, params):
    """RealNVP.forward: returns (z, log_det_jacobian), both shaped like x."""
    masks, w1, b1, w2, b2, w3, b3 = params
    return realnvp_pallas(x, masks, w1, b1, w2, b2, w3, b3)


def realnvp_reference(x, params):
    """Pure-JAX reference of the same forward pass (for correctness check)."""
    masks, w1, b1, w2, b2, w3, b3 = params
    K = masks.shape[0]
    D = x.shape[1]
    z = x
    ldj = jnp.zeros_like(x)
    for k in range(K):
        m = masks[k]
        xm = z * m
        h1 = jnp.maximum(jnp.dot(xm, w1[k]) + b1[k], 0.0)
        h2 = jnp.maximum(jnp.dot(h1, w2[k]) + b2[k], 0.0)
        out = jnp.dot(h2, w3[k]) + b3[k]
        s = jnp.tanh(out[:, :D]) * (1.0 - m)
        t = out[:, D:] * (1.0 - m)
        z = xm + (1.0 - m) * (z * jnp.exp(s) + t)
        ldj = ldj + s
    return z, ldj


# TODO(synk): RealNVP.invert() (inverse flow) is not part of forward() and is
# not implemented here.

if __name__ == "__main__":
    key = jax.random.PRNGKey(0)
    key, kx = jax.random.split(key)

    B, D, H, K = 8, 2, 32, 4
    x = jax.random.normal(kx, (B, D), jnp.float32)
    params = init_realnvp_params(key, num_transforms=K, data_dim=D, hidden=H)

    z, ldj = realnvp_forward(x, params)
    jax.block_until_ready((z, ldj))

    z_ref, ldj_ref = realnvp_reference(x, params)

    assert z.shape == (B, D) and ldj.shape == (B, D)
    assert jnp.all(jnp.isfinite(z)) and jnp.all(jnp.isfinite(ldj))
    assert jnp.allclose(z, z_ref, atol=1e-4, rtol=1e-4)
    assert jnp.allclose(ldj, ldj_ref, atol=1e-4, rtol=1e-4)
    print("KERNEL_OK")
</pallas_src>

<mosaic_0001>
module attributes {stable_mosaic.version = 11 : i64} {
  func.func @_realnvp_fused_kernel(%arg0: memref<8x2xf32, #tpu.memory_space<vmem>>, %arg1: memref<4x1x2xf32, #tpu.memory_space<vmem>>, %arg2: memref<4x2x32xf32, #tpu.memory_space<vmem>>, %arg3: memref<4x1x32xf32, #tpu.memory_space<vmem>>, %arg4: memref<4x32x32xf32, #tpu.memory_space<vmem>>, %arg5: memref<4x1x32xf32, #tpu.memory_space<vmem>>, %arg6: memref<4x32x2xf32, #tpu.memory_space<vmem>>, %arg7: memref<4x1x2xf32, #tpu.memory_space<vmem>>, %arg8: memref<4x32x2xf32, #tpu.memory_space<vmem>>, %arg9: memref<4x1x2xf32, #tpu.memory_space<vmem>>, %arg10: memref<8x2xf32, #tpu.memory_space<vmem>>, %arg11: memref<8x2xf32, #tpu.memory_space<vmem>>) attributes {dimension_semantics = [], scalar_prefetch = 0 : i64, scratch_operands = 0 : i64, tpu.core_type = #tpu.core_type<tc>} {
    %c0 = arith.constant 0 : index
    %c0_0 = arith.constant 0 : index
    %0 = vector.load %arg0[%c0, %c0_0] : memref<8x2xf32, #tpu.memory_space<vmem>>, vector<8x2xf32>
    %cst = arith.constant 0.000000e+00 : f32
    %1 = vector.broadcast %cst : f32 to vector<8x2xf32>
    %c0_1 = arith.constant 0 : index
    %c0_2 = arith.constant 0 : index
    %c0_3 = arith.constant 0 : index
    %2 = vector.load %arg1[%c0_1, %c0_2, %c0_3] : memref<4x1x2xf32, #tpu.memory_space<vmem>>, vector<1x1x2xf32>
    %3 = vector.shape_cast %2 : vector<1x1x2xf32> to vector<1x2xf32>
    %cst_4 = arith.constant 1.000000e+00 : f32
    %4 = vector.broadcast %cst_4 : f32 to vector<1x2xf32>
    %5 = arith.subf %4, %3 : vector<1x2xf32>
    %6 = vector.broadcast %3 : vector<1x2xf32> to vector<8x2xf32>
    %7 = arith.mulf %0, %6 : vector<8x2xf32>
    %c0_5 = arith.constant 0 : index
    %c0_6 = arith.constant 0 : index
    %c0_7 = arith.constant 0 : index
    %8 = vector.load %arg2[%c0_5, %c0_6, %c0_7] : memref<4x2x32xf32, #tpu.memory_space<vmem>>, vector<1x2x32xf32>
    %9 = vector.shape_cast %8 : vector<1x2x32xf32> to vector<2x32xf32>
    %c0_8 = arith.constant 0 : index
    %c0_9 = arith.constant 0 : index
    %c0_10 = arith.constant 0 : index
    %10 = vector.load %arg3[%c0_8, %c0_9, %c0_10] : memref<4x1x32xf32, #tpu.memory_space<vmem>>, vector<1x1x32xf32>
    %11 = vector.shape_cast %10 : vector<1x1x32xf32> to vector<1x32xf32>
    %12 = vector.extract_strided_slice %7 {offsets = [0, 0], sizes = [8, 1], strides = [1, 1]} : vector<8x2xf32> to vector<8x1xf32>
    %13 = vector.extract_strided_slice %9 {offsets = [0, 0], sizes = [1, 32], strides = [1, 1]} : vector<2x32xf32> to vector<1x32xf32>
    %14 = vector.broadcast %12 : vector<8x1xf32> to vector<8x32xf32>
    %15 = vector.broadcast %13 : vector<1x32xf32> to vector<8x32xf32>
    %16 = arith.mulf %14, %15 : vector<8x32xf32>
    %17 = vector.broadcast %11 : vector<1x32xf32> to vector<8x32xf32>
    %18 = arith.addf %17, %16 : vector<8x32xf32>
    %19 = vector.extract_strided_slice %7 {offsets = [0, 1], sizes = [8, 1], strides = [1, 1]} : vector<8x2xf32> to vector<8x1xf32>
    %20 = vector.extract_strided_slice %9 {offsets = [1, 0], sizes = [1, 32], strides = [1, 1]} : vector<2x32xf32> to vector<1x32xf32>
    %21 = vector.broadcast %19 : vector<8x1xf32> to vector<8x32xf32>
    %22 = vector.broadcast %20 : vector<1x32xf32> to vector<8x32xf32>
    %23 = arith.mulf %21, %22 : vector<8x32xf32>
    %24 = arith.addf %18, %23 : vector<8x32xf32>
    %cst_11 = arith.constant 0.000000e+00 : f32
    %25 = vector.broadcast %cst_11 : f32 to vector<8x32xf32>
    %26 = arith.maximumf %24, %25 : vector<8x32xf32>
    %c0_12 = arith.constant 0 : index
    %c0_13 = arith.constant 0 : index
    %c0_14 = arith.constant 0 : index
    %27 = vector.load %arg4[%c0_12, %c0_13, %c0_14] : memref<4x32x32xf32, #tpu.memory_space<vmem>>, vector<1x32x32xf32>
    %28 = vector.shape_cast %27 : vector<1x32x32xf32> to vector<32x32xf32>
    %cst_15 = arith.constant dense<0.000000e+00> : vector<8x32xf32>
    %29 = tpu.matmul %26, %28, %cst_15 {dimension_numbers = #tpu.dot_dimension_numbers<[1], [0], [0], [1], [0, 0, 1, 1], [], []>} : vector<8x32xf32>, vector<32x32xf32>, vector<8x32xf32> -> vector<8x32xf32>
    %c0_16 = arith.constant 0 : index
    %c0_17 = arith.constant 0 : index
    %c0_18 = arith.constant 0 : index
    %30 = vector.load %arg5[%c0_16, %c0_17, %c0_18] : memref<4x1x32xf32, #tpu.memory_space<vmem>>, vector<1x1x32xf32>
    %31 = vector.shape_cast %30 : vector<1x1x32xf32> to vector<1x32xf32>
    %32 = vector.broadcast %31 : vector<1x32xf32> to vector<8x32xf32>
    %33 = arith.addf %29, %32 : vector<8x32xf32>
    %cst_19 = arith.constant 0.000000e+00 : f32
    %34 = vector.broadcast %cst_19 : f32 to vector<8x32xf32>
    %35 = arith.maximumf %33, %34 : vector<8x32xf32>
    %c0_20 = arith.constant 0 : index
    %c0_21 = arith.constant 0 : index
    %c0_22 = arith.constant 0 : index
    %36 = vector.load %arg6[%c0_20, %c0_21, %c0_22] : memref<4x32x2xf32, #tpu.memory_space<vmem>>, vector<1x32x2xf32>
    %37 = vector.shape_cast %36 : vector<1x32x2xf32> to vector<32x2xf32>
    %cst_23 = arith.constant dense<0.000000e+00> : vector<8x2xf32>
    %38 = tpu.matmul %35, %37, %cst_23 {dimension_numbers = #tpu.dot_dimension_numbers<[1], [0], [0], [1], [0, 0, 1, 1], [], []>} : vector<8x32xf32>, vector<32x2xf32>, vector<8x2xf32> -> vector<8x2xf32>
    %c0_24 = arith.constant 0 : index
    %c0_25 = arith.constant 0 : index
    %c0_26 = arith.constant 0 : index
    %39 = vector.load %arg7[%c0_24, %c0_25, %c0_26] : memref<4x1x2xf32, #tpu.memory_space<vmem>>, vector<1x1x2xf32>
    %40 = vector.shape_cast %39 : vector<1x1x2xf32> to vector<1x2xf32>
    %41 = vector.broadcast %40 : vector<1x2xf32> to vector<8x2xf32>
    %42 = arith.addf %38, %41 : vector<8x2xf32>
    %c0_27 = arith.constant 0 : index
    %c0_28 = arith.constant 0 : index
    %c0_29 = arith.constant 0 : index
    %43 = vector.load %arg8[%c0_27, %c0_28, %c0_29] : memref<4x32x2xf32, #tpu.memory_space<vmem>>, vector<1x32x2xf32>
    %44 = vector.shape_cast %43 : vector<1x32x2xf32> to vector<32x2xf32>
    %cst_30 = arith.constant dense<0.000000e+00> : vector<8x2xf32>
    %45 = tpu.matmul %35, %44, %cst_30 {dimension_numbers = #tpu.dot_dimension_numbers<[1], [0], [0], [1], [0, 0, 1, 1], [], []>} : vector<8x32xf32>, vector<32x2xf32>, vector<8x2xf32> -> vector<8x2xf32>
    %c0_31 = arith.constant 0 : index
    %c0_32 = arith.constant 0 : index
    %c0_33 = arith.constant 0 : index
    %46 = vector.load %arg9[%c0_31, %c0_32, %c0_33] : memref<4x1x2xf32, #tpu.memory_space<vmem>>, vector<1x1x2xf32>
    %47 = vector.shape_cast %46 : vector<1x1x2xf32> to vector<1x2xf32>
    %48 = vector.broadcast %47 : vector<1x2xf32> to vector<8x2xf32>
    %49 = arith.addf %45, %48 : vector<8x2xf32>
    %50 = math.tanh %42 : vector<8x2xf32>
    %51 = vector.broadcast %5 : vector<1x2xf32> to vector<8x2xf32>
    %52 = arith.mulf %50, %51 : vector<8x2xf32>
    %53 = vector.broadcast %5 : vector<1x2xf32> to vector<8x2xf32>
    %54 = arith.mulf %49, %53 : vector<8x2xf32>
    %55 = math.exp %52 : vector<8x2xf32>
    %56 = arith.mulf %0, %55 : vector<8x2xf32>
    %57 = arith.addf %56, %54 : vector<8x2xf32>
    %58 = vector.broadcast %5 : vector<1x2xf32> to vector<8x2xf32>
    %59 = arith.mulf %58, %57 : vector<8x2xf32>
    %60 = arith.addf %7, %59 : vector<8x2xf32>
    %61 = arith.addf %1, %52 : vector<8x2xf32>
    %c1 = arith.constant 1 : index
    %c0_34 = arith.constant 0 : index
    %c0_35 = arith.constant 0 : index
    %62 = vector.load %arg1[%c1, %c0_34, %c0_35] : memref<4x1x2xf32, #tpu.memory_space<vmem>>, vector<1x1x2xf32>
    %63 = vector.shape_cast %62 : vector<1x1x2xf32> to vector<1x2xf32>
    %cst_36 = arith.constant 1.000000e+00 : f32
    %64 = vector.broadcast %cst_36 : f32 to vector<1x2xf32>
    %65 = arith.subf %64, %63 : vector<1x2xf32>
    %66 = vector.broadcast %63 : vector<1x2xf32> to vector<8x2xf32>
    %67 = arith.mulf %60, %66 : vector<8x2xf32>
    %c1_37 = arith.constant 1 : index
    %c0_38 = arith.constant 0 : index
    %c0_39 = arith.constant 0 : index
    %68 = vector.load %arg2[%c1_37, %c0_38, %c0_39] : memref<4x2x32xf32, #tpu.memory_space<vmem>>, vector<1x2x32xf32>
    %69 = vector.shape_cast %68 : vector<1x2x32xf32> to vector<2x32xf32>
    %c1_40 = arith.constant 1 : index
    %c0_41 = arith.constant 0 : index
    %c0_42 = arith.constant 0 : index
    %70 = vector.load %arg3[%c1_40, %c0_41, %c0_42] : memref<4x1x32xf32, #tpu.memory_space<vmem>>, vector<1x1x32xf32>
    %71 = vector.shape_cast %70 : vector<1x1x32xf32> to vector<1x32xf32>
    %72 = vector.extract_strided_slice %67 {offsets = [0, 0], sizes = [8, 1], strides = [1, 1]} : vector<8x2xf32> to vector<8x1xf32>
    %73 = vector.extract_strided_slice %69 {offsets = [0, 0], sizes = [1, 32], strides = [1, 1]} : vector<2x32xf32> to vector<1x32xf32>
    %74 = vector.broadcast %72 : vector<8x1xf32> to vector<8x32xf32>
    %75 = vector.broadcast %73 : vector<1x32xf32> to vector<8x32xf32>
    %76 = arith.mulf %74, %75 : vector<8x32xf32>
    %77 = vector.broadcast %71 : vector<1x32xf32> to vector<8x32xf32>
    %78 = arith.addf %77, %76 : vector<8x32xf32>
    %79 = vector.extract_strided_slice %67 {offsets = [0, 1], sizes = [8, 1], strides = [1, 1]} : vector<8x2xf32> to vector<8x1xf32>
    %80 = vector.extract_strided_slice %69 {offsets = [1, 0], sizes = [1, 32], strides = [1, 1]} : vector<2x32xf32> to vector<1x32xf32>
    %81 = vector.broadcast %79 : vector<8x1xf32> to vector<8x32xf32>
    %82 = vector.broadcast %80 : vector<1x32xf32> to vector<8x32xf32>
    %83 = arith.mulf %81, %82 : vector<8x32xf32>
    %84 = arith.addf %78, %83 : vector<8x32xf32>
    %cst_43 = arith.constant 0.000000e+00 : f32
    %85 = vector.broadcast %cst_43 : f32 to vector<8x32xf32>
    %86 = arith.maximumf %84, %85 : vector<8x32xf32>
    %c1_44 = arith.constant 1 : index
    %c0_45 = arith.constant 0 : index
    %c0_46 = arith.constant 0 : index
    %87 = vector.load %arg4[%c1_44, %c0_45, %c0_46] : memref<4x32x32xf32, #tpu.memory_space<vmem>>, vector<1x32x32xf32>
    %88 = vector.shape_cast %87 : vector<1x32x32xf32> to vector<32x32xf32>
    %cst_47 = arith.constant dense<0.000000e+00> : vector<8x32xf32>
    %89 = tpu.matmul %86, %88, %cst_47 {dimension_numbers = #tpu.dot_dimension_numbers<[1], [0], [0], [1], [0, 0, 1, 1], [], []>} : vector<8x32xf32>, vector<32x32xf32>, vector<8x32xf32> -> vector<8x32xf32>
    %c1_48 = arith.constant 1 : index
    %c0_49 = arith.constant 0 : index
    %c0_50 = arith.constant 0 : index
    %90 = vector.load %arg5[%c1_48, %c0_49, %c0_50] : memref<4x1x32xf32, #tpu.memory_space<vmem>>, vector<1x1x32xf32>
    %91 = vector.shape_cast %90 : vector<1x1x32xf32> to vector<1x32xf32>
    %92 = vector.broadcast %91 : vector<1x32xf32> to vector<8x32xf32>
    %93 = arith.addf %89, %92 : vector<8x32xf32>
    %cst_51 = arith.constant 0.000000e+00 : f32
    %94 = vector.broadcast %cst_51 : f32 to vector<8x32xf32>
    %95 = arith.maximumf %93, %94 : vector<8x32xf32>
    %c1_52 = arith.constant 1 : index
    %c0_53 = arith.constant 0 : index
    %c0_54 = arith.constant 0 : index
    %96 = vector.load %arg6[%c1_52, %c0_53, %c0_54] : memref<4x32x2xf32, #tpu.memory_space<vmem>>, vector<1x32x2xf32>
    %97 = vector.shape_cast %96 : vector<1x32x2xf32> to vector<32x2xf32>
    %cst_55 = arith.constant dense<0.000000e+00> : vector<8x2xf32>
    %98 = tpu.matmul %95, %97, %cst_55 {dimension_numbers = #tpu.dot_dimension_numbers<[1], [0], [0], [1], [0, 0, 1, 1], [], []>} : vector<8x32xf32>, vector<32x2xf32>, vector<8x2xf32> -> vector<8x2xf32>
    %c1_56 = arith.constant 1 : index
    %c0_57 = arith.constant 0 : index
    %c0_58 = arith.constant 0 : index
    %99 = vector.load %arg7[%c1_56, %c0_57, %c0_58] : memref<4x1x2xf32, #tpu.memory_space<vmem>>, vector<1x1x2xf32>
    %100 = vector.shape_cast %99 : vector<1x1x2xf32> to vector<1x2xf32>
    %101 = vector.broadcast %100 : vector<1x2xf32> to vector<8x2xf32>
    %102 = arith.addf %98, %101 : vector<8x2xf32>
    %c1_59 = arith.constant 1 : index
    %c0_60 = arith.constant 0 : index
    %c0_61 = arith.constant 0 : index
    %103 = vector.load %arg8[%c1_59, %c0_60, %c0_61] : memref<4x32x2xf32, #tpu.memory_space<vmem>>, vector<1x32x2xf32>
    %104 = vector.shape_cast %103 : vector<1x32x2xf32> to vector<32x2xf32>
    %cst_62 = arith.constant dense<0.000000e+00> : vector<8x2xf32>
    %105 = tpu.matmul %95, %104, %cst_62 {dimension_numbers = #tpu.dot_dimension_numbers<[1], [0], [0], [1], [0, 0, 1, 1], [], []>} : vector<8x32xf32>, vector<32x2xf32>, vector<8x2xf32> -> vector<8x2xf32>
    %c1_63 = arith.constant 1 : index
    %c0_64 = arith.constant 0 : index
    %c0_65 = arith.constant 0 : index
    %106 = vector.load %arg9[%c1_63, %c0_64, %c0_65] : memref<4x1x2xf32, #tpu.memory_space<vmem>>, vector<1x1x2xf32>
    %107 = vector.shape_cast %106 : vector<1x1x2xf32> to vector<1x2xf32>
    %108 = vector.broadcast %107 : vector<1x2xf32> to vector<8x2xf32>
    %109 = arith.addf %105, %108 : vector<8x2xf32>
    %110 = math.tanh %102 : vector<8x2xf32>
    %111 = vector.broadcast %65 : vector<1x2xf32> to vector<8x2xf32>
    %112 = arith.mulf %110, %111 : vector<8x2xf32>
    %113 = vector.broadcast %65 : vector<1x2xf32> to vector<8x2xf32>
    %114 = arith.mulf %109, %113 : vector<8x2xf32>
    %115 = math.exp %112 : vector<8x2xf32>
    %116 = arith.mulf %60, %115 : vector<8x2xf32>
    %117 = arith.addf %116, %114 : vector<8x2xf32>
    %118 = vector.broadcast %65 : vector<1x2xf32> to vector<8x2xf32>
    %119 = arith.mulf %118, %117 : vector<8x2xf32>
    %120 = arith.addf %67, %119 : vector<8x2xf32>
    %121 = arith.addf %61, %112 : vector<8x2xf32>
    %c2 = arith.constant 2 : index
    %c0_66 = arith.constant 0 : index
    %c0_67 = arith.constant 0 : index
    %122 = vector.load %arg1[%c2, %c0_66, %c0_67] : memref<4x1x2xf32, #tpu.memory_space<vmem>>, vector<1x1x2xf32>
    %123 = vector.shape_cast %122 : vector<1x1x2xf32> to vector<1x2xf32>
    %cst_68 = arith.constant 1.000000e+00 : f32
    %124 = vector.broadcast %cst_68 : f32 to vector<1x2xf32>
    %125 = arith.subf %124, %123 : vector<1x2xf32>
    %126 = vector.broadcast %123 : vector<1x2xf32> to vector<8x2xf32>
    %127 = arith.mulf %120, %126 : vector<8x2xf32>
    %c2_69 = arith.constant 2 : index
    %c0_70 = arith.constant 0 : index
    %c0_71 = arith.constant 0 : index
    %128 = vector.load %arg2[%c2_69, %c0_70, %c0_71] : memref<4x2x32xf32, #tpu.memory_space<vmem>>, vector<1x2x32xf32>
    %129 = vector.shape_cast %128 : vector<1x2x32xf32> to vector<2x32xf32>
    %c2_72 = arith.constant 2 : index
    %c0_73 = arith.constant 0 : index
    %c0_74 = arith.constant 0 : index
    %130 = vector.load %arg3[%c2_72, %c0_73, %c0_74] : memref<4x1x32xf32, #tpu.memory_space<vmem>>, vector<1x1x32xf32>
    %131 = vector.shape_cast %130 : vector<1x1x32xf32> to vector<1x32xf32>
    %132 = vector.extract_strided_slice %127 {offsets = [0, 0], sizes = [8, 1], strides = [1, 1]} : vector<8x2xf32> to vector<8x1xf32>
    %133 = vector.extract_strided_slice %129 {offsets = [0, 0], sizes = [1, 32], strides = [1, 1]} : vector<2x32xf32> to vector<1x32xf32>
    %134 = vector.broadcast %132 : vector<8x1xf32> to vector<8x32xf32>
    %135 = vector.broadcast %133 : vector<1x32xf32> to vector<8x32xf32>
    %136 = arith.mulf %134, %135 : vector<8x32xf32>
    %137 = vector.broadcast %131 : vector<1x32xf32> to vector<8x32xf32>
    %138 = arith.addf %137, %136 : vector<8x32xf32>
    %139 = vector.extract_strided_slice %127 {offsets = [0, 1], sizes = [8, 1], strides = [1, 1]} : vector<8x2xf32> to vector<8x1xf32>
    %140 = vector.extract_strided_slice %129 {offsets = [1, 0], sizes = [1, 32], strides = [1, 1]} : vector<2x32xf32> to vector<1x32xf32>
    %141 = vector.broadcast %139 : vector<8x1xf32> to vector<8x32xf32>
    %142 = vector.broadcast %140 : vector<1x32xf32> to vector<8x32xf32>
    %143 = arith.mulf %141, %142 : vector<8x32xf32>
    %144 = arith.addf %138, %143 : vector<8x32xf32>
    %cst_75 = arith.constant 0.000000e+00 : f32
    %145 = vector.broadcast %cst_75 : f32 to vector<8x32xf32>
    %146 = arith.maximumf %144, %145 : vector<8x32xf32>
    %c2_76 = arith.constant 2 : index
    %c0_77 = arith.constant 0 : index
    %c0_78 = arith.constant 0 : index
    %147 = vector.load %arg4[%c2_76, %c0_77, %c0_78] : memref<4x32x32xf32, #tpu.memory_space<vmem>>, vector<1x32x32xf32>
    %148 = vector.shape_cast %147 : vector<1x32x32xf32> to vector<32x32xf32>
    %cst_79 = arith.constant dense<0.000000e+00> : vector<8x32xf32>
    %149 = tpu.matmul %146, %148, %cst_79 {dimension_numbers = #tpu.dot_dimension_numbers<[1], [0], [0], [1], [0, 0, 1, 1], [], []>} : vector<8x32xf32>, vector<32x32xf32>, vector<8x32xf32> -> vector<8x32xf32>
    %c2_80 = arith.constant 2 : index
    %c0_81 = arith.constant 0 : index
    %c0_82 = arith.constant 0 : index
    %150 = vector.load %arg5[%c2_80, %c0_81, %c0_82] : memref<4x1x32xf32, #tpu.memory_space<vmem>>, vector<1x1x32xf32>
    %151 = vector.shape_cast %150 : vector<1x1x32xf32> to vector<1x32xf32>
    %152 = vector.broadcast %151 : vector<1x32xf32> to vector<8x32xf32>
    %153 = arith.addf %149, %152 : vector<8x32xf32>
    %cst_83 = arith.constant 0.000000e+00 : f32
    %154 = vector.broadcast %cst_83 : f32 to vector<8x32xf32>
    %155 = arith.maximumf %153, %154 : vector<8x32xf32>
    %c2_84 = arith.constant 2 : index
    %c0_85 = arith.constant 0 : index
    %c0_86 = arith.constant 0 : index
    %156 = vector.load %arg6[%c2_84, %c0_85, %c0_86] : memref<4x32x2xf32, #tpu.memory_space<vmem>>, vector<1x32x2xf32>
    %157 = vector.shape_cast %156 : vector<1x32x2xf32> to vector<32x2xf32>
    %cst_87 = arith.constant dense<0.000000e+00> : vector<8x2xf32>
    %158 = tpu.matmul %155, %157, %cst_87 {dimension_numbers = #tpu.dot_dimension_numbers<[1], [0], [0], [1], [0, 0, 1, 1], [], []>} : vector<8x32xf32>, vector<32x2xf32>, vector<8x2xf32> -> vector<8x2xf32>
    %c2_88 = arith.constant 2 : index
    %c0_89 = arith.constant 0 : index
    %c0_90 = arith.constant 0 : index
    %159 = vector.load %arg7[%c2_88, %c0_89, %c0_90] : memref<4x1x2xf32, #tpu.memory_space<vmem>>, vector<1x1x2xf32>
    %160 = vector.shape_cast %159 : vector<1x1x2xf32> to vector<1x2xf32>
    %161 = vector.broadcast %160 : vector<1x2xf32> to vector<8x2xf32>
    %162 = arith.addf %158, %161 : vector<8x2xf32>
    %c2_91 = arith.constant 2 : index
    %c0_92 = arith.constant 0 : index
    %c0_93 = arith.constant 0 : index
    %163 = vector.load %arg8[%c2_91, %c0_92, %c0_93] : memref<4x32x2xf32, #tpu.memory_space<vmem>>, vector<1x32x2xf32>
    %164 = vector.shape_cast %163 : vector<1x32x2xf32> to vector<32x2xf32>
    %cst_94 = arith.constant dense<0.000000e+00> : vector<8x2xf32>
    %165 = tpu.matmul %155, %164, %cst_94 {dimension_numbers = #tpu.dot_dimension_numbers<[1], [0], [0], [1], [0, 0, 1, 1], [], []>} : vector<8x32xf32>, vector<32x2xf32>, vector<8x2xf32> -> vector<8x2xf32>
    %c2_95 = arith.constant 2 : index
    %c0_96 = arith.constant 0 : index
    %c0_97 = arith.constant 0 : index
    %166 = vector.load %arg9[%c2_95, %c0_96, %c0_97] : memref<4x1x2xf32, #tpu.memory_space<vmem>>, vector<1x1x2xf32>
    %167 = vector.shape_cast %166 : vector<1x1x2xf32> to vector<1x2xf32>
    %168 = vector.broadcast %167 : vector<1x2xf32> to vector<8x2xf32>
    %169 = arith.addf %165, %168 : vector<8x2xf32>
    %170 = math.tanh %162 : vector<8x2xf32>
    %171 = vector.broadcast %125 : vector<1x2xf32> to vector<8x2xf32>
    %172 = arith.mulf %170, %171 : vector<8x2xf32>
    %173 = vector.broadcast %125 : vector<1x2xf32> to vector<8x2xf32>
    %174 = arith.mulf %169, %173 : vector<8x2xf32>
    %175 = math.exp %172 : vector<8x2xf32>
    %176 = arith.mulf %120, %175 : vector<8x2xf32>
    %177 = arith.addf %176, %174 : vector<8x2xf32>
    %178 = vector.broadcast %125 : vector<1x2xf32> to vector<8x2xf32>
    %179 = arith.mulf %178, %177 : vector<8x2xf32>
    %180 = arith.addf %127, %179 : vector<8x2xf32>
    %181 = arith.addf %121, %172 : vector<8x2xf32>
    %c3 = arith.constant 3 : index
    %c0_98 = arith.constant 0 : index
    %c0_99 = arith.constant 0 : index
    %182 = vector.load %arg1[%c3, %c0_98, %c0_99] : memref<4x1x2xf32, #tpu.memory_space<vmem>>, vector<1x1x2xf32>
    %183 = vector.shape_cast %182 : vector<1x1x2xf32> to vector<1x2xf32>
    %cst_100 = arith.constant 1.000000e+00 : f32
    %184 = vector.broadcast %cst_100 : f32 to vector<1x2xf32>
    %185 = arith.subf %184, %183 : vector<1x2xf32>
    %186 = vector.broadcast %183 : vector<1x2xf32> to vector<8x2xf32>
    %187 = arith.mulf %180, %186 : vector<8x2xf32>
    %c3_101 = arith.constant 3 : index
    %c0_102 = arith.constant 0 : index
    %c0_103 = arith.constant 0 : index
    %188 = vector.load %arg2[%c3_101, %c0_102, %c0_103] : memref<4x2x32xf32, #tpu.memory_space<vmem>>, vector<1x2x32xf32>
    %189 = vector.shape_cast %188 : vector<1x2x32xf32> to vector<2x32xf32>
    %c3_104 = arith.constant 3 : index
    %c0_105 = arith.constant 0 : index
    %c0_106 = arith.constant 0 : index
    %190 = vector.load %arg3[%c3_104, %c0_105, %c0_106] : memref<4x1x32xf32, #tpu.memory_space<vmem>>, vector<1x1x32xf32>
    %191 = vector.shape_cast %190 : vector<1x1x32xf32> to vector<1x32xf32>
    %192 = vector.extract_strided_slice %187 {offsets = [0, 0], sizes = [8, 1], strides = [1, 1]} : vector<8x2xf32> to vector<8x1xf32>
    %193 = vector.extract_strided_slice %189 {offsets = [0, 0], sizes = [1, 32], strides = [1, 1]} : vector<2x32xf32> to vector<1x32xf32>
    %194 = vector.broadcast %192 : vector<8x1xf32> to vector<8x32xf32>
    %195 = vector.broadcast %193 : vector<1x32xf32> to vector<8x32xf32>
    %196 = arith.mulf %194, %195 : vector<8x32xf32>
    %197 = vector.broadcast %191 : vector<1x32xf32> to vector<8x32xf32>
    %198 = arith.addf %197, %196 : vector<8x32xf32>
    %199 = vector.extract_strided_slice %187 {offsets = [0, 1], sizes = [8, 1], strides = [1, 1]} : vector<8x2xf32> to vector<8x1xf32>
    %200 = vector.extract_strided_slice %189 {offsets = [1, 0], sizes = [1, 32], strides = [1, 1]} : vector<2x32xf32> to vector<1x32xf32>
    %201 = vector.broadcast %199 : vector<8x1xf32> to vector<8x32xf32>
    %202 = vector.broadcast %200 : vector<1x32xf32> to vector<8x32xf32>
    %203 = arith.mulf %201, %202 : vector<8x32xf32>
    %204 = arith.addf %198, %203 : vector<8x32xf32>
    %cst_107 = arith.constant 0.000000e+00 : f32
    %205 = vector.broadcast %cst_107 : f32 to vector<8x32xf32>
    %206 = arith.maximumf %204, %205 : vector<8x32xf32>
    %c3_108 = arith.constant 3 : index
    %c0_109 = arith.constant 0 : index
    %c0_110 = arith.constant 0 : index
    %207 = vector.load %arg4[%c3_108, %c0_109, %c0_110] : memref<4x32x32xf32, #tpu.memory_space<vmem>>, vector<1x32x32xf32>
    %208 = vector.shape_cast %207 : vector<1x32x32xf32> to vector<32x32xf32>
    %cst_111 = arith.constant dense<0.000000e+00> : vector<8x32xf32>
    %209 = tpu.matmul %206, %208, %cst_111 {dimension_numbers = #tpu.dot_dimension_numbers<[1], [0], [0], [1], [0, 0, 1, 1], [], []>} : vector<8x32xf32>, vector<32x32xf32>, vector<8x32xf32> -> vector<8x32xf32>
    %c3_112 = arith.constant 3 : index
    %c0_113 = arith.constant 0 : index
    %c0_114 = arith.constant 0 : index
    %210 = vector.load %arg5[%c3_112, %c0_113, %c0_114] : memref<4x1x32xf32, #tpu.memory_space<vmem>>, vector<1x1x32xf32>
    %211 = vector.shape_cast %210 : vector<1x1x32xf32> to vector<1x32xf32>
    %212 = vector.broadcast %211 : vector<1x32xf32> to vector<8x32xf32>
    %213 = arith.addf %209, %212 : vector<8x32xf32>
    %cst_115 = arith.constant 0.000000e+00 : f32
    %214 = vector.broadcast %cst_115 : f32 to vector<8x32xf32>
    %215 = arith.maximumf %213, %214 : vector<8x32xf32>
    %c3_116 = arith.constant 3 : index
    %c0_117 = arith.constant 0 : index
    %c0_118 = arith.constant 0 : index
    %216 = vector.load %arg6[%c3_116, %c0_117, %c0_118] : memref<4x32x2xf32, #tpu.memory_space<vmem>>, vector<1x32x2xf32>
    %217 = vector.shape_cast %216 : vector<1x32x2xf32> to vector<32x2xf32>
    %cst_119 = arith.constant dense<0.000000e+00> : vector<8x2xf32>
    %218 = tpu.matmul %215, %217, %cst_119 {dimension_numbers = #tpu.dot_dimension_numbers<[1], [0], [0], [1], [0, 0, 1, 1], [], []>} : vector<8x32xf32>, vector<32x2xf32>, vector<8x2xf32> -> vector<8x2xf32>
    %c3_120 = arith.constant 3 : index
    %c0_121 = arith.constant 0 : index
    %c0_122 = arith.constant 0 : index
    %219 = vector.load %arg7[%c3_120, %c0_121, %c0_122] : memref<4x1x2xf32, #tpu.memory_space<vmem>>, vector<1x1x2xf32>
    %220 = vector.shape_cast %219 : vector<1x1x2xf32> to vector<1x2xf32>
    %221 = vector.broadcast %220 : vector<1x2xf32> to vector<8x2xf32>
    %222 = arith.addf %218, %221 : vector<8x2xf32>
    %c3_123 = arith.constant 3 : index
    %c0_124 = arith.constant 0 : index
    %c0_125 = arith.constant 0 : index
    %223 = vector.load %arg8[%c3_123, %c0_124, %c0_125] : memref<4x32x2xf32, #tpu.memory_space<vmem>>, vector<1x32x2xf32>
    %224 = vector.shape_cast %223 : vector<1x32x2xf32> to vector<32x2xf32>
    %cst_126 = arith.constant dense<0.000000e+00> : vector<8x2xf32>
    %225 = tpu.matmul %215, %224, %cst_126 {dimension_numbers = #tpu.dot_dimension_numbers<[1], [0], [0], [1], [0, 0, 1, 1], [], []>} : vector<8x32xf32>, vector<32x2xf32>, vector<8x2xf32> -> vector<8x2xf32>
    %c3_127 = arith.constant 3 : index
    %c0_128 = arith.constant 0 : index
    %c0_129 = arith.constant 0 : index
    %226 = vector.load %arg9[%c3_127, %c0_128, %c0_129] : memref<4x1x2xf32, #tpu.memory_space<vmem>>, vector<1x1x2xf32>
    %227 = vector.shape_cast %226 : vector<1x1x2xf32> to vector<1x2xf32>
    %228 = vector.broadcast %227 : vector<1x2xf32> to vector<8x2xf32>
    %229 = arith.addf %225, %228 : vector<8x2xf32>
    %230 = math.tanh %222 : vector<8x2xf32>
    %231 = vector.broadcast %185 : vector<1x2xf32> to vector<8x2xf32>
    %232 = arith.mulf %230, %231 : vector<8x2xf32>
    %233 = vector.broadcast %185 : vector<1x2xf32> to vector<8x2xf32>
    %234 = arith.mulf %229, %233 : vector<8x2xf32>
    %235 = math.exp %232 : vector<8x2xf32>
    %236 = arith.mulf %180, %235 : vector<8x2xf32>
    %237 = arith.addf %236, %234 : vector<8x2xf32>
    %238 = vector.broadcast %185 : vector<1x2xf32> to vector<8x2xf32>
    %239 = arith.mulf %238, %237 : vector<8x2xf32>
    %240 = arith.addf %187, %239 : vector<8x2xf32>
    %241 = arith.addf %181, %232 : vector<8x2xf32>
    %c0_130 = arith.constant 0 : index
    %c0_131 = arith.constant 0 : index
    %242 = vector.load %arg10[%c0_130, %c0_131] : memref<8x2xf32, #tpu.memory_space<vmem>>, vector<8x2xf32>
    tpu.vector_store %arg10[%c0_130, %c0_131], %240 {strides = array<i32>} : memref<8x2xf32, #tpu.memory_space<vmem>>, vector<8x2xf32>,
    %c0_132 = arith.constant 0 : index
    %c0_133 = arith.constant 0 : index
    %243 = vector.load %arg11[%c0_132, %c0_133] : memref<8x2xf32, #tpu.memory_space<vmem>>, vector<8x2xf32>
    tpu.vector_store %arg11[%c0_132, %c0_133], %241 {strides = array<i32>} : memref<8x2xf32, #tpu.memory_space<vmem>>, vector<8x2xf32>,
    return
  }
}

</mosaic_0001>

<bundles_post_ra>
// kernel: realnvp_forward.1
= control target key start
LH: loop header
LB: loop body
LE: loop exit
PB: predicated region body
PF: predicated region fallthrough
CT: control target
= control target key end

     0   :  { %v41_v0 = vlaneseq  ;;  %v1596_v1 = vmov 0   ;;  %v1597_v8 = vmov 0.0   ;;  %v1598_v12 = vmov 1   ;;  %s2057_s1 = inlined_call_operand.vmem [shape: f32[4,1,2], index: 1, kind: input, shape index: {}]   ;;  %s2058_s0 = inlined_call_operand.vmem [shape: f32[8,2], index: 0, kind: input, shape index: {}]   ;;  %s2059_s4 = inlined_call_operand.vmem [shape: f32[4,32,32], index: 4, kind: input, shape index: {}]   ;;  %s2060_s6 = inlined_call_operand.vmem [shape: f32[4,32,2], index: 6, kind: input, shape index: {}]   ;;  %s2061_s2 = inlined_call_operand.vmem [shape: f32[4,2,32], index: 2, kind: input, shape index: {}]   ;;  %s2062_s3 = inlined_call_operand.vmem [shape: f32[4,1,32], index: 3, kind: input, shape index: {}]   ;;  %s2063_s8 = inlined_call_operand.vmem [shape: f32[4,32,2], index: 8, kind: input, shape index: {}]   ;;  %s2064_s5 = inlined_call_operand.vmem [shape: f32[4,1,32], index: 5, kind: input, shape index: {}]   ;;  %s2065_s7 = inlined_call_operand.vmem [shape: f32[4,1,2], index: 7, kind: input, shape index: {}]   ;;  %s2066_s9 = inlined_call_operand.vmem [shape: f32[4,1,2], index: 9, kind: input, shape index: {}]   ;;  %s2067_s11 = inlined_call_operand.vmem [shape: f32[8,2], index: 11, kind: output, shape index: {1}]   ;;  %s2068_s10 = inlined_call_operand.vmem [shape: f32[8,2], index: 10, kind: output, shape index: {0}]  }
   0x1   :  { %1575 = vset.pattern.permute.xlu0 %v1596_v1  ;;  %1577 = vset.pattern.permute.xlu1 %v1596_v1  ;;  %v1665_v3 = vld [vmem:[%s2057_s1] sm:$0x1]  ;;  %v80_v9 = vld [vmem:[%s2059_s4 + $0x18] sm:$0xff]  ;;  %v79_v10 = vld [vmem:[%s2059_s4 + $0x10] sm:$0xff]  ;;  %vm1599_vm0 = vmmov 0   ;;  %vm88_vm1 = vcmask 261120  }
   0x2   :  { %v42_v2 = vshrl.u32 %v41_v0, 7  ;;  %v1672_v5 = vld [vmem:[%s2058_s0] sm:$0xff]  ;;  %1439 = vmatprep.subr.mxu0 %v1597_v8  ;;  %1450 = vmatprep.subr.mxu1 %v1597_v8  ;;  %v78_v11 = vld [vmem:[%s2059_s4 + $0x8] sm:$0xff]  ;;  %v166_v14 = vld [vmem:[%s2060_s6 + $0x18] sm:$0xff]  ;;  %v39_v45 = vsub.f32 1.0, %v1665_v3  ;;  %vm1286_vm2 = vcmask 15360  }
   0x3   :  { %1440 = vmatpush3.msra.mxu0 %v80_v9  ;;  %v77_v13 = vld [vmem:[%s2059_s4] sm:$0xff]  ;;  %1447 = vmatprep.mubr.msk.f32.mxu0 %vm1599_vm0, %v1597_v8  ;;  %v250_v27 = vld [vmem:[%s2063_s8 + $0x18] sm:$0xff]  ;;  %v165_v28 = vld [vmem:[%s2060_s6 + $0x10] sm:$0xff] }
   0x4   :  { %v1667_v4 = vsub.s32 0, %v42_v2  ;;  %1441 = vmatprep.subr.mxu0 %v1597_v8  ;;  %1458 = vmatprep.mubr.msk.f32.mxu1 %vm1599_vm0, %v1597_v8  ;;  %v47_v15 = vld [vmem:[%s2061_s2] sm:$0x3]  ;;  %v1712_v17 = vsub.s32 1, %v42_v2  ;;  %v249_v29 = vld [vmem:[%s2063_s8 + $0x10] sm:$0xff]  ;;  %v164_v30 = vld [vmem:[%s2060_s6 + $0x8] sm:$0xff] }
   0x5   :  { %1442 = vmatpush3.msra.mxu0 %v79_v10  ;;  %1451 = vmatpush3.msra.mxu1 %v166_v14  ;;  %v1297_v21 = vld [vmem:[%s2062_s3] ss:$0 sm:$0xff]  ;;  %v248_v31 = vld [vmem:[%s2063_s8 + $0x8] sm:$0xff]  ;;  %v1773_v55 = vld [vmem:[%s2057_s1 + $0x1] sm:$0x1] }
   0x6   :  { %v44_v6 = vrot.slane %v1665_v3, %v1667_v4  ;;  %1443 = vmatprep.subr.mxu0 %v1597_v8  ;;  %1452 = vmatprep.subr.mxu1 %v1597_v8  ;;  %v57_v16 = vrot.slane %v47_v15, %v1667_v4  ;;  %v73_v20 = vrot.slane %v47_v15, %v1712_v17  ;;  %v163_v32 = vld [vmem:[%s2060_s6] sm:$0xff]  ;;  %v1311_v61 = vld [vmem:[%s2059_s4 + $0x38] sm:$0xff]  ;;  %v1310_v62 = vld [vmem:[%s2059_s4 + $0x30] sm:$0xff] }
   0x7   :  { %1444 = vmatpush3.msra.mxu0 %v78_v11  ;;  %1453 = vmatpush3.msra.mxu1 %v165_v28  ;;  %v247_v33 = vld [vmem:[%s2063_s8] sm:$0xff]  ;;  %v333_v46 = vrot.slane %v39_v45, %v1667_v4  ;;  %v351_v58 = vrot.slane %v1773_v55, %v1667_v4  ;;  %v1309_v63 = vld [vmem:[%s2059_s4 + $0x28] sm:$0xff]  ;;  %v1318_v2 = vld [vmem:[%s2060_s6 + $0x38] sm:$0xff] }
   0x8   :  { %v1677_v7 = vmul.f32 %v44_v6, %v1672_v5  ;;  %1445 = vmatprep.subr.mxu0 %v1597_v8  ;;  %1454 = vmatprep.subr.mxu1 %v1597_v8  ;;  %v1298_v34 = vld [vmem:[%s2064_s5] ss:$0 sm:$0xff]  ;;  %v1305_v3 = vld [vmem:[%s2061_s2 + $0x2] sm:$0x3]  ;;  %v1307_v10 = vld [vmem:[%s2062_s3 + $0x1] ss:$0 sm:$0xff] }
   0x9   :  { %1446 = vmatpush3.msra.mxu0 %v77_v13  ;;  %1455 = vmatpush3.msra.mxu1 %v164_v30  ;;  %v1300_v39 = vld [vmem:[%s2065_s7] ss:$0 sm:$0xff]  ;;  %v382_v9 = vrot.slane %v1305_v3, %v1712_v17  ;;  %v1320_v28 = vld [vmem:[%s2065_s7 + $0x1] ss:$0 sm:$0xff] }
   0xa   :  { %51 = vperm.xlu0 %1575, %v1677_v7   ;;  %1461 = vmatprep.subr.mxu0 %v1597_v8  ;;  %v1302_v50 = vld [vmem:[%s2066_s9] ss:$0 sm:$0xff] }
   0xb   :  { %1456 = vmatprep.subr.mxu1 %v1597_v8  ;;  %v1308_v0 = vld [vmem:[%s2059_s4 + $0x20] sm:$0xff] }
   0xc   :  { %1457 = vmatpush3.msra.mxu1 %v163_v32 }
   0xd   :  { %1472 = vmatprep.subr.mxu1 %v1597_v8 }
   0xe   :  { %1576 = vset.pattern.permute.xlu0 %v1598_v12 }
   0xf   :  { %67 = vperm.xlu0 %1576, %v1677_v7  }
  0x85   :  { %v52_v18 = vpop.permute.xlu0 %51 }
  0x86   :  { %v58_v19 = vmul.f32 %v57_v16, %v52_v18  ;;  %v1317_v16 = vld [vmem:[%s2060_s6 + $0x30] sm:$0xff] }
  0x87   :  { %v1324_v18 = vld [vmem:[%s2063_s8 + $0x30] sm:$0xff] }
  0x88   :  { %v65_v23 = vadd.f32 %v1297_v21, %v58_v19  ;;  %v1316_v19 = vld [vmem:[%s2060_s6 + $0x28] sm:$0xff]  ;;  %v1315_v21 = vld [vmem:[%s2060_s6 + $0x20] sm:$0xff] }
  0x8a   :  { %v68_v22 = vpop.permute.xlu0 %67 }
  0x8b   :  { %v74_v24 = vmul.f32 %v73_v20, %v68_v22  ;;  %v1323_v20 = vld [vmem:[%s2063_s8 + $0x28] sm:$0xff]  ;;  %v1322_v22 = vld [vmem:[%s2063_s8 + $0x20] sm:$0xff] }
  0x8d   :  { %v75_v25 = vadd.f32 %v74_v24, %v65_v23  ;;  %v1313_v23 = vld [vmem:[%s2064_s5 + $0x1] ss:$0 sm:$0xff] }
  0x8f   :  { %v76_v26 = vmax.f32 %v75_v25, 0.0 }
  0x91   :  { %1448 = vmatmul.mubr.msk.f32.vlgmr.msra.gmra.mxu0 %vm88_vm1, %v76_v26 }
  0x92   :  { %1462 = vmatpush3.msra.mxu0 %v250_v27  ;;  %1469 = vmatprep.mubr.msk.f32.mxu0 %vm1599_vm0, %v1597_v8 }
  0x93   :  { %1463 = vmatprep.subr.mxu0 %v1597_v8 }
  0x94   :  { %1464 = vmatpush3.msra.mxu0 %v249_v29 }
  0x95   :  { %1465 = vmatprep.subr.mxu0 %v1597_v8 }
  0x96   :  { %1466 = vmatpush3.msra.mxu0 %v248_v31 }
  0x97   :  { %1467 = vmatprep.subr.mxu0 %v1597_v8 }
  0x98   :  { %1468 = vmatpush3.msra.mxu0 %v247_v33 }
  0x99   :  { %1483 = vmatprep.subr.mxu0 %v1597_v8 }
 0x151   :  { %v158_v35 = vpop.f32.mrf.mxu0 }
 0x152   :  { %v159_v36 = vadd.f32 %v1298_v34, %v158_v35  ;;  %v346_v34 = vsub.f32 1.0, %v1773_v55  ;;  %v1343_v55 = vld [vmem:[%s2060_s6 + $0x58] sm:$0xff] }
 0x153   :  { %v1449_v37 = vpop.f32.mrf.mxu0 }
 0x154   :  { %v162_v38 = vmax.f32 %v159_v36, 0.0  ;;  %v647_v35 = vrot.slane %v346_v34, %v1667_v4 }
 0x156   :  { %1459 = vmatmul.mubr.msk.f32.vlgmr.msra.gmra.mxu1 %vm88_vm1, %v162_v38  ;;  %1470 = vmatmul.mubr.msk.f32.vlgmr.msra.gmra.mxu0 %vm88_vm1, %v162_v38 }
 0x157   :  { %1480 = vmatprep.mubr.msk.f32.mxu1 %vm1599_vm0, %v1597_v8  ;;  %1491 = vmatprep.mubr.msk.f32.mxu0 %vm1599_vm0, %v1597_v8 }
 0x158   :  { %1473 = vmatpush3.msra.mxu1 %v1311_v61  ;;  %1484 = vmatpush3.msra.mxu0 %v1318_v2 }
 0x159   :  { %1474 = vmatprep.subr.mxu1 %v1597_v8  ;;  %1485 = vmatprep.subr.mxu0 %v1597_v8 }
 0x15a   :  { %1475 = vmatpush3.msra.mxu1 %v1310_v62  ;;  %1486 = vmatpush3.msra.mxu0 %v1317_v16 }
 0x15b   :  { %1476 = vmatprep.subr.mxu1 %v1597_v8  ;;  %1487 = vmatprep.subr.mxu0 %v1597_v8 }
 0x15c   :  { %1477 = vmatpush3.msra.mxu1 %v1309_v63  ;;  %1488 = vmatpush3.msra.mxu0 %v1316_v19 }
 0x15d   :  { %1478 = vmatprep.subr.mxu1 %v1597_v8  ;;  %1489 = vmatprep.subr.mxu0 %v1597_v8 }
 0x15e   :  { %1479 = vmatpush3.msra.mxu1 %v1308_v0  ;;  %1490 = vmatpush3.msra.mxu0 %v1315_v21 }
 0x15f   :  { %1494 = vmatprep.subr.mxu1 %v1597_v8  ;;  %1505 = vmatprep.subr.mxu0 %v1597_v8 }
 0x216   :  { %v243_v40 = vpop.f32.mrf.mxu1  ;;  %v324_v41 = vpop.f32.mrf.mxu0 }
 0x217   :  { %v244_v42 = vadd.f32 %v1300_v39, %v243_v40  ;;  %v325_v51 = vadd.f32 %v1302_v50, %v324_v41  ;;  %v1327_v39 = vld [vmem:[%s2066_s9 + $0x1] ss:$0 sm:$0xff]  ;;  %v1336_v50 = vld [vmem:[%s2059_s4 + $0x58] sm:$0xff] }
 0x218   :  { %v1460_v43 = vpop.f32.mrf.mxu1  ;;  %v1471_v44 = vpop.f32.mrf.mxu0 }
 0x219   :  { %1580 = vtanh.f32 %v244_v42  ;;  %v336_v53 = vmul.f32 %v333_v46, %v325_v51  ;;  %v1870_v44 = vld [vmem:[%s2057_s1 + $0x2] sm:$0x1] }
 0x226   :  { %v1581_v47 = vpop.eup %1580 }
 0x227   :  { %v1763_v48 = vmul.f32 %v1581_v47, %v333_v46  ;;  %v665_v47 = vrot.slane %v1870_v44, %v1667_v4 }
 0x229   :  { %v337_v49 = vmul.f32 1.442695, %v1763_v48 }
 0x22b   :  { %1582 = vpow2.f32 %v337_v49 }
 0x238   :  { %v1583_v52 = vpop.eup %1582 }
 0x239   :  { %v339_v54 = vmul.f32 %v1583_v52, %v1672_v5  ;;  %v366_v5 = vrot.slane %v1305_v3, %v1667_v4  ;;  %v1335_v52 = vld [vmem:[%s2059_s4 + $0x50] sm:$0xff] }
 0x23b   :  { %v340_v56 = vadd.f32 %v339_v54, %v336_v53  ;;  %v1334_v53 = vld [vmem:[%s2059_s4 + $0x48] sm:$0xff]  ;;  %v1333_v54 = vld [vmem:[%s2059_s4 + $0x40] sm:$0xff] }
 0x23d   :  { %v341_v57 = vmul.f32 %v340_v56, %v333_v46  ;;  %v1330_v56 = vld [vmem:[%s2061_s2 + $0x4] sm:$0x3] }
 0x23f   :  { %v1778_v59 = vadd.f32 %v341_v57, %v1677_v7  ;;  %v680_v57 = vrot.slane %v1330_v56, %v1667_v4 }
 0x241   :  { %v1781_v60 = vmul.f32 %v351_v58, %v1778_v59  ;;  %v696_v58 = vrot.slane %v1330_v56, %v1712_v17 }
 0x243   :  { %360 = vperm.xlu1 %1577, %v1781_v60  }
 0x247   :  { %1578 = vset.pattern.permute.xlu1 %v1598_v12 }
 0x248   :  { %376 = vperm.xlu1 %1578, %v1781_v60  }
 0x24c   :  { %1579 = vset.pattern.permute.xlu1 %v1596_v1  ;;  %v1325_v1 = vld [vmem:[%s2063_s8 + $0x38] sm:$0xff] }
 0x2be   :  { %v361_v6 = vpop.permute.xlu1 %360 }
 0x2bf   :  { %v367_v7 = vmul.f32 %v366_v5, %v361_v6  ;;  %v1350_v5 = vld [vmem:[%s2063_s8 + $0x58] sm:$0xff]  ;;  %v1342_v6 = vld [vmem:[%s2060_s6 + $0x50] sm:$0xff] }
 0x2c1   :  { %v374_v12 = vadd.f32 %v1307_v10, %v367_v7  ;;  %v1349_v7 = vld [vmem:[%s2063_s8 + $0x50] sm:$0xff]  ;;  %v1348_v10 = vld [vmem:[%s2063_s8 + $0x48] sm:$0xff] }
 0x2c3   :  { %v377_v11 = vpop.permute.xlu1 %376 }
 0x2c4   :  { %v383_v13 = vmul.f32 %v382_v9, %v377_v11  ;;  %v1341_v9 = vld [vmem:[%s2060_s6 + $0x48] sm:$0xff]  ;;  %v1340_v11 = vld [vmem:[%s2060_s6 + $0x40] sm:$0xff] }
 0x2c6   :  { %v384_v14 = vadd.f32 %v383_v13, %v374_v12  ;;  %v1347_v12 = vld [vmem:[%s2063_s8 + $0x40] sm:$0xff] }
 0x2c7   :  { %v1338_v13 = vld [vmem:[%s2064_s5 + $0x2] ss:$0 sm:$0xff] }
 0x2c8   :  { %v385_v15 = vmax.f32 %v384_v14, 0.0 }
 0x2ca   :  { %1481 = vmatmul.mubr.msk.f32.vlgmr.msra.gmra.mxu1 %vm88_vm1, %v385_v15 }
 0x2cb   :  { %1495 = vmatpush3.msra.mxu1 %v1325_v1  ;;  %1502 = vmatprep.mubr.msk.f32.mxu1 %vm1599_vm0, %v1597_v8 }
 0x2cc   :  { %1496 = vmatprep.subr.mxu1 %v1597_v8 }
 0x2cd   :  { %1497 = vmatpush3.msra.mxu1 %v1324_v18  ;;  %v1345_v18 = vld [vmem:[%s2065_s7 + $0x2] ss:$0 sm:$0xff] }
 0x2ce   :  { %1498 = vmatprep.subr.mxu1 %v1597_v8 }
 0x2cf   :  { %1499 = vmatpush3.msra.mxu1 %v1323_v20 }
 0x2d0   :  { %1500 = vmatprep.subr.mxu1 %v1597_v8 }
 0x2d1   :  { %1501 = vmatpush3.msra.mxu1 %v1322_v22 }
 0x2d2   :  { %1516 = vmatprep.subr.mxu1 %v1597_v8 }
 0x38a   :  { %v468_v24 = vpop.f32.mrf.mxu1 }
 0x38b   :  { %v469_v25 = vadd.f32 %v1313_v23, %v468_v24  ;;  %v660_v24 = vsub.f32 1.0, %v1870_v44  ;;  %v1358_v44 = vld [vmem:[%s2059_s4 + $0x60] sm:$0xff] }
 0x38c   :  { %v1482_v26 = vpop.f32.mrf.mxu1 }
 0x38d   :  { %v472_v27 = vmax.f32 %v469_v25, 0.0  ;;  %v961_v25 = vrot.slane %v660_v24, %v1667_v4 }
 0x38f   :  { %1492 = vmatmul.mubr.msk.f32.vlgmr.msra.gmra.mxu0 %vm88_vm1, %v472_v27  ;;  %1503 = vmatmul.mubr.msk.f32.vlgmr.msra.gmra.mxu1 %vm88_vm1, %v472_v27 }
 0x390   :  { %1513 = vmatprep.mubr.msk.f32.mxu0 %vm1599_vm0, %v1597_v8  ;;  %1524 = vmatprep.mubr.msk.f32.mxu1 %vm1599_vm0, %v1597_v8 }
 0x391   :  { %1506 = vmatpush3.msra.mxu0 %v1336_v50  ;;  %1517 = vmatpush3.msra.mxu1 %v1343_v55 }
 0x392   :  { %1507 = vmatprep.subr.mxu0 %v1597_v8  ;;  %1518 = vmatprep.subr.mxu1 %v1597_v8 }
 0x393   :  { %1508 = vmatpush3.msra.mxu0 %v1335_v52  ;;  %1519 = vmatpush3.msra.mxu1 %v1342_v6 }
 0x394   :  { %1509 = vmatprep.subr.mxu0 %v1597_v8  ;;  %1520 = vmatprep.subr.mxu1 %v1597_v8 }
 0x395   :  { %1510 = vmatpush3.msra.mxu0 %v1334_v53  ;;  %1521 = vmatpush3.msra.mxu1 %v1341_v9 }
 0x396   :  { %1511 = vmatprep.subr.mxu0 %v1597_v8  ;;  %1522 = vmatprep.subr.mxu1 %v1597_v8 }
 0x397   :  { %1512 = vmatpush3.msra.mxu0 %v1333_v54  ;;  %1523 = vmatpush3.msra.mxu1 %v1340_v11 }
 0x398   :  { %1527 = vmatprep.subr.mxu0 %v1597_v8  ;;  %1538 = vmatprep.subr.mxu1 %v1597_v8 }
 0x44f   :  { %v555_v29 = vpop.f32.mrf.mxu0  ;;  %v638_v30 = vpop.f32.mrf.mxu1 }
 0x450   :  { %v556_v31 = vadd.f32 %v1320_v28, %v555_v29  ;;  %v639_v40 = vadd.f32 %v1327_v39, %v638_v30 }
 0x451   :  { %v1493_v32 = vpop.f32.mrf.mxu0  ;;  %v1504_v33 = vpop.f32.mrf.mxu1 }
 0x452   :  { %1584 = vtanh.f32 %v556_v31  ;;  %v650_v42 = vmul.f32 %v647_v35, %v639_v40  ;;  %v1352_v31 = vld [vmem:[%s2066_s9 + $0x2] ss:$0 sm:$0xff]  ;;  %v1361_v40 = vld [vmem:[%s2059_s4 + $0x78] sm:$0xff] }
 0x45f   :  { %v1585_v36 = vpop.eup %1584 }
 0x460   :  { %v1860_v37 = vmul.f32 %v1585_v36, %v647_v35  ;;  %v1966_v36 = vld [vmem:[%s2057_s1 + $0x3] sm:$0x1] }
 0x462   :  { %v651_v38 = vmul.f32 1.442695, %v1860_v37  ;;  %v657_v27 = vadd.f32 %v1860_v37, %v1763_v48 }
 0x464   :  { %1586 = vpow2.f32 %v651_v38  ;;  %v979_v38 = vrot.slane %v1966_v36, %v1667_v4 }
 0x471   :  { %v1587_v41 = vpop.eup %1586 }
 0x472   :  { %v653_v43 = vmul.f32 %v1587_v41, %v1778_v59 }
 0x474   :  { %v654_v45 = vadd.f32 %v653_v43, %v650_v42  ;;  %v1360_v42 = vld [vmem:[%s2059_s4 + $0x70] sm:$0xff]  ;;  %v1359_v43 = vld [vmem:[%s2059_s4 + $0x68] sm:$0xff] }
 0x476   :  { %v655_v46 = vmul.f32 %v654_v45, %v647_v35  ;;  %v1368_v45 = vld [vmem:[%s2060_s6 + $0x78] sm:$0xff] }
 0x478   :  { %v1875_v49 = vadd.f32 %v655_v46, %v1781_v60  ;;  %v1332_v60 = vld [vmem:[%s2062_s3 + $0x2] ss:$0 sm:$0xff]  ;;  %v1355_v46 = vld [vmem:[%s2061_s2 + $0x6] sm:$0x3] }
 0x47a   :  { %v1881_v51 = vmul.f32 %v665_v47, %v1875_v49  ;;  %v994_v47 = vrot.slane %v1355_v46, %v1667_v4 }
 0x47c   :  { %690 = vperm.xlu0 %1576, %v1881_v51   ;;  %674 = vperm.xlu1 %1579, %v1881_v51  }
 0x4f7   :  { %v691_v59 = vpop.permute.xlu0 %690  ;;  %v675_v61 = vpop.permute.xlu1 %674 }
 0x4f8   :  { %v681_v62 = vmul.f32 %v680_v57, %v675_v61  ;;  %v697_v63 = vmul.f32 %v696_v58, %v691_v59  ;;  %v1375_v58 = vld [vmem:[%s2063_s8 + $0x78] sm:$0xff]  ;;  %v1374_v59 = vld [vmem:[%s2063_s8 + $0x70] sm:$0xff]  ;;  %v1373_v61 = vld [vmem:[%s2063_s8 + $0x68] sm:$0xff] }
 0x4fa   :  { %v688_v0 = vadd.f32 %v1332_v60, %v681_v62  ;;  %v1366_v60 = vld [vmem:[%s2060_s6 + $0x68] sm:$0xff]  ;;  %v1365_v62 = vld [vmem:[%s2060_s6 + $0x60] sm:$0xff] }
 0x4fc   :  { %v698_v2 = vadd.f32 %v697_v63, %v688_v0  ;;  %v1372_v63 = vld [vmem:[%s2063_s8 + $0x60] sm:$0xff] }
 0x4fd   :  { %v1363_v0 = vld [vmem:[%s2064_s5 + $0x3] ss:$0 sm:$0xff] }
 0x4fe   :  { %v699_v3 = vmax.f32 %v698_v2, 0.0 }
 0x500   :  { %1514 = vmatmul.mubr.msk.f32.vlgmr.msra.gmra.mxu0 %vm88_vm1, %v699_v3 }
 0x501   :  { %1528 = vmatpush3.msra.mxu0 %v1350_v5  ;;  %1535 = vmatprep.mubr.msk.f32.mxu0 %vm1599_vm0, %v1597_v8 }
 0x502   :  { %1529 = vmatprep.subr.mxu0 %v1597_v8 }
 0x503   :  { %1530 = vmatpush3.msra.mxu0 %v1349_v7 }
 0x504   :  { %1531 = vmatprep.subr.mxu0 %v1597_v8 }
 0x505   :  { %1532 = vmatpush3.msra.mxu0 %v1348_v10 }
 0x506   :  { %1533 = vmatprep.subr.mxu0 %v1597_v8 }
 0x507   :  { %1534 = vmatpush3.msra.mxu0 %v1347_v12 }
 0x508   :  { %1549 = vmatprep.subr.mxu0 %v1597_v8 }
 0x5c0   :  { %v782_v14 = vpop.f32.mrf.mxu0 }
 0x5c1   :  { %v783_v15 = vadd.f32 %v1338_v13, %v782_v14  ;;  %v974_v13 = vsub.f32 1.0, %v1966_v36 }
 0x5c2   :  { %v1515_v1 = vpop.f32.mrf.mxu0 }
 0x5c3   :  { %v786_v16 = vmax.f32 %v783_v15, 0.0  ;;  %v1275_v14 = vrot.slane %v974_v13, %v1667_v4 }
 0x5c5   :  { %1525 = vmatmul.mubr.msk.f32.vlgmr.msra.gmra.mxu1 %vm88_vm1, %v786_v16  ;;  %1536 = vmatmul.mubr.msk.f32.vlgmr.msra.gmra.mxu0 %vm88_vm1, %v786_v16 }
 0x5c6   :  { %1546 = vmatprep.mubr.msk.f32.mxu1 %vm1599_vm0, %v1597_v8  ;;  %1557 = vmatprep.mubr.msk.f32.mxu0 %vm1599_vm0, %v1597_v8 }
 0x5c7   :  { %1539 = vmatpush3.msra.mxu1 %v1361_v40  ;;  %1550 = vmatpush3.msra.mxu0 %v1368_v45 }
 0x5c8   :  { %1540 = vmatprep.subr.mxu1 %v1597_v8  ;;  %1551 = vmatprep.subr.mxu0 %v1597_v8 }
 0x5c9   :  { %1541 = vmatpush3.msra.mxu1 %v1360_v42 }
 0x5ca   :  { %1542 = vmatprep.subr.mxu1 %v1597_v8 }
 0x5cb   :  { %1543 = vmatpush3.msra.mxu1 %v1359_v43 }
 0x5cc   :  { %1544 = vmatprep.subr.mxu1 %v1597_v8 }
 0x5cd   :  { %1545 = vmatpush3.msra.mxu1 %v1358_v44 }
 0x5ce   :  { %1560 = vmatprep.subr.mxu1 %v1597_v8 }
 0x685   :  { %v869_v19 = vpop.f32.mrf.mxu1  ;;  %v952_v20 = vpop.f32.mrf.mxu0 }
 0x686   :  { %v870_v21 = vadd.f32 %v1345_v18, %v869_v19  ;;  %v953_v32 = vadd.f32 %v1352_v31, %v952_v20  ;;  %v1377_v19 = vld [vmem:[%s2066_s9 + $0x3] ss:$0 sm:$0xff] }
 0x687   :  { %v1526_v22 = vpop.f32.mrf.mxu1  ;;  %v1537_v23 = vpop.f32.mrf.mxu0 }
 0x688   :  { %1588 = vtanh.f32 %v870_v21  ;;  %v964_v34 = vmul.f32 %v961_v25, %v953_v32 }
 0x695   :  { %v1589_v26 = vpop.eup %1588 }
 0x696   :  { %v963_v28 = vmul.f32 %v1589_v26, %v961_v25 }
 0x698   :  { %v965_v29 = vmul.f32 1.442695, %v963_v28  ;;  %v1957_v30 = vadd.f32 %v963_v28, %v657_v27 }
 0x69a   :  { %1590 = vpow2.f32 %v965_v29 }
 0x6a7   :  { %v1591_v33 = vpop.eup %1590 }
 0x6a8   :  { %v967_v35 = vmul.f32 %v1591_v33, %v1875_v49  ;;  %v1010_v49 = vrot.slane %v1355_v46, %v1712_v17  ;;  %v1367_v17 = vld [vmem:[%s2060_s6 + $0x70] sm:$0xff] }
 0x6a9   :  { %1552 = vmatpush3.msra.mxu0 %v1367_v17 }
 0x6aa   :  { %v968_v48 = vadd.f32 %v967_v35, %v964_v34  ;;  %1553 = vmatprep.subr.mxu0 %v1597_v8 }
 0x6ab   :  { %1554 = vmatpush3.msra.mxu0 %v1366_v60 }
 0x6ac   :  { %v969_v37 = vmul.f32 %v968_v48, %v961_v25  ;;  %1555 = vmatprep.subr.mxu0 %v1597_v8 }
 0x6ad   :  { %1556 = vmatpush3.msra.mxu0 %v1365_v62 }
 0x6ae   :  { %v1971_v39 = vadd.f32 %v969_v37, %v1881_v51  ;;  %v1357_v51 = vld [vmem:[%s2062_s3 + $0x3] ss:$0 sm:$0xff] }
 0x6b0   :  { %v1977_v41 = vmul.f32 %v979_v38, %v1971_v39 }
 0x6b2   :  { %1004 = vperm.xlu0 %1576, %v1977_v41   ;;  %988 = vperm.xlu1 %1579, %v1977_v41  }
 0x72d   :  { %v1005_v50 = vpop.permute.xlu0 %1004  ;;  %v989_v52 = vpop.permute.xlu1 %988 }
 0x72e   :  { %v995_v53 = vmul.f32 %v994_v47, %v989_v52  ;;  %v1011_v54 = vmul.f32 %v1010_v49, %v1005_v50 }
 0x730   :  { %v1002_v55 = vadd.f32 %v1357_v51, %v995_v53 }
 0x732   :  { %v1012_v56 = vadd.f32 %v1011_v54, %v1002_v55 }
 0x734   :  { %v1013_v57 = vmax.f32 %v1012_v56, 0.0 }
 0x736   :  { %1547 = vmatmul.mubr.msk.f32.vlgmr.msra.gmra.mxu1 %vm88_vm1, %v1013_v57 }
 0x737   :  { %1561 = vmatpush3.msra.mxu1 %v1375_v58  ;;  %1568 = vmatprep.mubr.msk.f32.mxu1 %vm1599_vm0, %v1597_v8 }
 0x738   :  { %1562 = vmatprep.subr.mxu1 %v1597_v8 }
 0x739   :  { %1563 = vmatpush3.msra.mxu1 %v1374_v59 }
 0x73a   :  { %1564 = vmatprep.subr.mxu1 %v1597_v8 }
 0x73b   :  { %1565 = vmatpush3.msra.mxu1 %v1373_v61 }
 0x73c   :  { %1566 = vmatprep.subr.mxu1 %v1597_v8  ;;  %v1370_v8 = vld [vmem:[%s2065_s7 + $0x3] ss:$0 sm:$0xff] }
 0x73d   :  { %1567 = vmatpush3.msra.mxu1 %v1372_v63 }
 0x7f6   :  { %v1096_v2 = vpop.f32.mrf.mxu1 }
 0x7f7   :  { %v1097_v3 = vadd.f32 %v1363_v0, %v1096_v2 }
 0x7f8   :  { %v1548_v5 = vpop.f32.mrf.mxu1 }
 0x7f9   :  { %v1100_v6 = vmax.f32 %v1097_v3, 0.0 }
 0x7fb   :  { %1558 = vmatmul.mubr.msk.f32.vlgmr.msra.gmra.mxu0 %vm88_vm1, %v1100_v6  ;;  %1569 = vmatmul.mubr.msk.f32.vlgmr.msra.gmra.mxu1 %vm88_vm1, %v1100_v6 }
 0x8bb   :  { %v1183_v7 = vpop.f32.mrf.mxu0  ;;  %v1266_v9 = vpop.f32.mrf.mxu1 }
 0x8bc   :  { %v1184_v10 = vadd.f32 %v1370_v8, %v1183_v7  ;;  %v1267_v20 = vadd.f32 %v1377_v19, %v1266_v9 }
 0x8bd   :  { %v1559_v11 = vpop.f32.mrf.mxu0  ;;  %v1570_v12 = vpop.f32.mrf.mxu1 }
 0x8be   :  { %1592 = vtanh.f32 %v1184_v10  ;;  %v1278_v22 = vmul.f32 %v1275_v14, %v1267_v20 }
 0x8cb   :  { %v1593_v15 = vpop.eup %1592 }
 0x8cc   :  { %v1277_v1 = vmul.f32 %v1593_v15, %v1275_v14 }
 0x8ce   :  { %v1279_v16 = vmul.f32 1.442695, %v1277_v1  ;;  %v1285_v18 = vadd.f32 %v1277_v1, %v1957_v30 }
 0x8d0   :  { %1594 = vpow2.f32 %v1279_v16  ;;  %1288 = vst.msk [vmem:[%s2067_s11] sm:$0xff] %vm1286_vm2, %v1285_v18 }
 0x8dd   :  { %v1595_v21 = vpop.eup %1594 }
 0x8de   :  { %v1281_v4 = vmul.f32 %v1595_v21, %v1971_v39 }
 0x8e0   :  { %v1282_v23 = vadd.f32 %v1281_v4, %v1278_v22 }
 0x8e2   :  { %v1283_v24 = vmul.f32 %v1282_v23, %v1275_v14 }
 0x8e4   :  { %v1284_v25 = vadd.f32 %v1283_v24, %v1977_v41 }
 0x8e6   :  { %1287 = vst.msk [vmem:[%s2068_s10] sm:$0xff] %vm1286_vm2, %v1284_v25 }

</bundles_post_ra>
